<compile_context>
chip_gen: v7x
topology: tpu7x:2x2x1
jax: 0.10.0
libtpu: 0.0.40
codegen_flags: <defaults>
</compile_context>

<pallas_src>
import math
import functools

import jax
import jax.numpy as jnp
from jax import lax
from jax.experimental import pallas as pl
from jax.experimental.pallas import tpu as pltpu

_VMEM_LIMIT = 48 * 1024 * 1024   # explicit scoped-VMEM budget (safe on v5e/v6e/v7x)
_NEG_INF = -1e30                 # finite "masked" value (avoids NaN for all-masked rows)


# ----------------------------- Linear kernel ------------------------------ #
def _linear_kernel(x_ref, w_ref, b_ref, o_ref):
    # x: (bm, in)  w: (in, out) [bf16]  b: (1, out) [f32]  ->  o: (bm, out)
    # MXU operands in bf16, accumulation in f32 (native bf16 MXU on v5e/v6e/v7x).
    x = x_ref[...].astype(jnp.bfloat16)
    w = w_ref[...].astype(jnp.bfloat16)
    acc = jnp.dot(x, w, preferred_element_type=jnp.float32) + b_ref[...]
    o_ref[...] = acc.astype(o_ref.dtype)


def pallas_linear(x2d, w_in_out, bias, *, block_m=512, out_dtype=None):
    """y = x2d @ w_in_out + bias, row-tiled with the (bf16) weight resident."""
    n, d_in = x2d.shape
    d_out = w_in_out.shape[1]
    if out_dtype is None:
        out_dtype = x2d.dtype
    bm = n if n <= block_m else block_m          # full extent for small N
    grid = (pl.cdiv(n, bm),)
    # The weight/bias index_maps are constant so they are fetched once and stay
    # resident; storing the weight in bf16 halves its VMEM footprint (keeps the
    # kernel inside the v5e 16 MiB / v7x 64 MiB budgets at larger E).
    return pl.pallas_call(
        _linear_kernel,
        out_shape=jax.ShapeDtypeStruct((n, d_out), out_dtype),
        grid=grid,
        in_specs=[
            pl.BlockSpec((bm, d_in), lambda i: (i, 0)),
            pl.BlockSpec((d_in, d_out), lambda i: (0, 0)),   # resident weight
            pl.BlockSpec((1, d_out), lambda i: (0, 0)),
        ],
        out_specs=pl.BlockSpec((bm, d_out), lambda i: (i, 0)),
        compiler_params=pltpu.CompilerParams(
            dimension_semantics=("parallel",),
            vmem_limit_bytes=_VMEM_LIMIT),
    )(x2d, w_in_out, bias.reshape(1, d_out))


# --------------------------- Attention kernel ------------------------------ #
def _attn_kernel(q_ref, k_ref, v_ref, m_ref, o_ref, *w_refs, num_heads, d_h):
    # Blocks (one (batch, tgt-tile) pair per grid step):
    #   q_ref: (1, tq, E)   k_ref / v_ref: (1, src, E)   m_ref: (1, 1, src) int8
    #   o_ref: (1, tq, E)   w_refs[0] (optional): (1, tq, src) f32
    q = q_ref[0]                       # (tq, E) -- Q already scaled by 1/sqrt(d_h)
    k = k_ref[0]                       # (src, E)
    v = v_ref[0]                       # (src, E)
    # Additive key-padding mask built in-kernel from the tiny int8 mask
    # (free VPU select; avoids a f32 mask materialization + 4x larger DMA).
    add_mask = jnp.where(m_ref[0] != 0, _NEG_INF, 0.0).astype(jnp.float32)   # (1, src)

    need_w = bool(w_refs)
    w_acc = None

    # Static unroll over heads; each head's context is stored immediately so at
    # most one head's (tq, src)/(tq, d_h) tiles stay live (no lane-axis concat,
    # low vreg pressure).  For d_h >= 128 the slices/stores are lane-aligned.
    # TODO(synk): for very long src on v7x (64 MiB VMEM) this should become a
    # flash-style online-softmax loop over src tiles instead of materializing
    # the full (tq, src) score matrix per head.
    for h in range(num_heads):
        sl = slice(h * d_h, (h + 1) * d_h)
        qh = q[:, sl].astype(jnp.bfloat16)           # (tq, d_h)
        kh = k[:, sl].astype(jnp.bfloat16)           # (src, d_h)
        vh = v[:, sl].astype(jnp.bfloat16)           # (src, d_h)

        # scores = q_scaled @ k^T + mask; contract d_h directly (no explicit k.T),
        # bf16 MXU operands with f32 accumulation.
        s = lax.dot_general(qh, kh, (((1,), (1,)), ((), ())),
                            preferred_element_type=jnp.float32) + add_mask   # (tq, src)

        # TODO(synk): torch.bernoulli(0.1) * -1e-12 perturbation omitted -- it is
        # nondeterministic and numerically below f32 epsilon (no softmax effect).
        mx = jnp.max(s, axis=-1, keepdims=True)
        e = jnp.exp(s - mx)
        denom = jnp.sum(e, axis=-1, keepdims=True)
        p = e * pl.reciprocal(denom, approx=True)     # softmax (EUP reciprocal)

        ctx_h = jnp.dot(p.astype(jnp.bfloat16), vh,
                        preferred_element_type=jnp.float32)   # (tq, d_h)
        o_ref[0, :, sl] = ctx_h.astype(o_ref.dtype)   # per-head store into the block

        if need_w:                                    # only pay for it if requested
            w_acc = p if w_acc is None else w_acc + p

    if need_w:   # averaged-over-heads attention weights, one store per block
        w_refs[0][0] = (w_acc * (1.0 / num_heads)).astype(w_refs[0].dtype)


def _q_spec(tq, E, col):
    return pl.BlockSpec((1, tq, E), lambda bi, ti: (bi, ti, col))


def _kv_spec(src, E, col):
    return pl.BlockSpec((1, src, E), lambda bi, ti: (bi, 0, col))


# ------------------------------ Full module -------------------------------- #
def multihead_attention(query, key, value, key_padding_mask, params, num_heads,
                        need_weights=True):
    tgt, bs, E = query.shape
    src = key.shape[0]
    d_h = E // num_heads

    # batch-first layout once, so attention blocks are lane-dense (1, L, E) slabs
    q_in = query.transpose(1, 0, 2).reshape(bs * tgt, E)

    # NOTE: fused path selected by object identity (same tensor passed 3x);
    # distinct-but-equal traced args fall back to the general path (not a bug).
    self_attn = (query is key) and (key is value)
    if self_attn and E % 128 == 0:
        # Fused QKV projection; the attention kernel DMAs Q/K/V directly as
        # column blocks of the (bs, tgt, 3E) slab -- no XLA slice round trip.
        qkv = pallas_linear(q_in, params["w_qkv"], params["b_qkv"],
                            out_dtype=jnp.bfloat16).reshape(bs, tgt, 3 * E)
        q_arr, k_arr, v_arr = qkv, qkv, qkv
        q_col, k_col, v_col = 0, 1, 2
    elif self_attn:
        # tiny-E fallback (column-block DMA needs E to be lane-aligned, E%128==0)
        qkv = pallas_linear(q_in, params["w_qkv"], params["b_qkv"],
                            out_dtype=jnp.bfloat16)
        q_arr = qkv[:, 0:E].reshape(bs, tgt, E)
        k_arr = qkv[:, E:2 * E].reshape(bs, src, E)
        v_arr = qkv[:, 2 * E:3 * E].reshape(bs, src, E)
        q_col = k_col = v_col = 0
    else:
        k_in = key.transpose(1, 0, 2).reshape(bs * src, E)
        v_in = value.transpose(1, 0, 2).reshape(bs * src, E)
        q_arr = pallas_linear(q_in, params["w_q"], params["b_q"],
                              out_dtype=jnp.bfloat16).reshape(bs, tgt, E)
        k_arr = pallas_linear(k_in, params["w_k"], params["b_k"],
                              out_dtype=jnp.bfloat16).reshape(bs, src, E)
        v_arr = pallas_linear(v_in, params["w_v"], params["b_v"],
                              out_dtype=jnp.bfloat16).reshape(bs, src, E)
        q_col = k_col = v_col = 0

    # tiny int8 key-padding mask; additive -1e30 mask is built inside the kernel
    mask_i8 = key_padding_mask.astype(jnp.int8).reshape(bs, 1, src)

    # tgt tiling bounds per-step VMEM (important on v7x's 64 MiB) and gives the
    # megacore more than `bs` parallel grid points; K/V stay resident per batch.
    tq = tgt if tgt <= 256 else 256
    grid = (bs, pl.cdiv(tgt, tq))

    in_specs = [
        _q_spec(tq, E, q_col),
        _kv_spec(src, E, k_col),
        _kv_spec(src, E, v_col),
        pl.BlockSpec((1, 1, src), lambda bi, ti: (bi, 0, 0)),
    ]
    o_spec = pl.BlockSpec((1, tq, E), lambda bi, ti: (bi, ti, 0))
    if need_weights:
        out_shape = (jax.ShapeDtypeStruct((bs, tgt, E), jnp.bfloat16),
                     jax.ShapeDtypeStruct((bs, tgt, src), jnp.float32))
        out_specs = (o_spec,
                     pl.BlockSpec((1, tq, src), lambda bi, ti: (bi, ti, 0)))
    else:
        out_shape = jax.ShapeDtypeStruct((bs, tgt, E), jnp.bfloat16)
        out_specs = o_spec

    results = pl.pallas_call(
        functools.partial(_attn_kernel, num_heads=num_heads, d_h=d_h),
        out_shape=out_shape,
        grid=grid,
        in_specs=in_specs,
        out_specs=out_specs,
        compiler_params=pltpu.CompilerParams(
            dimension_semantics=("parallel", "parallel"),   # no cross-step state
            vmem_limit_bytes=_VMEM_LIMIT),
    )(q_arr, k_arr, v_arr, mask_i8)

    if need_weights:
        attn_out, attn_w = results
    else:
        attn_out, attn_w = results, None

    # heads are already concatenated along E per row; out projection is row-wise
    ctx = attn_out.reshape(bs * tgt, E)
    out = pallas_linear(ctx, params["w_out"], params["b_out"],
                        out_dtype=jnp.float32)
    out = out.reshape(bs, tgt, E).transpose(1, 0, 2)      # back to (tgt, bs, E)

    if need_weights:
        return out, attn_w
    return out


# ---------------------------- Parameters ----------------------------------- #
def init_params(rng, embed_dim):
    """Raw parameters in the PyTorch layout (out, in)."""
    def xavier_uniform(k, shape):
        fan_out, fan_in = shape
        bound = math.sqrt(6.0 / (fan_in + fan_out))
        return jax.random.uniform(k, shape, jnp.float32, -bound, bound)

    k1, k2 = jax.random.split(rng)
    return dict(
        in_proj_weight=xavier_uniform(k1, (3 * embed_dim, embed_dim)),
        in_proj_bias=jnp.zeros((3 * embed_dim,), jnp.float32),
        out_proj_weight=xavier_uniform(k2, (embed_dim, embed_dim)),
        out_proj_bias=jnp.zeros((embed_dim,), jnp.float32),
    )


def prepare_params(raw, embed_dim, num_heads):
    """One-time weight prep hoisted out of the per-call path: transpose to
    (in, out), fold 1/sqrt(d_h) into the Q projection, pre-concatenate the
    fused QKV weight, and cast matmul weights to bf16 (MXU-native)."""
    E = embed_dim
    d_h = E // num_heads
    scale = 1.0 / math.sqrt(d_h)
    W, b = raw["in_proj_weight"], raw["in_proj_bias"]
    w_q = (W[0:E].T * scale).astype(jnp.bfloat16)
    w_k = W[E:2 * E].T.astype(jnp.bfloat16)
    w_v = W[2 * E:3 * E].T.astype(jnp.bfloat16)
    b_q = (b[0:E] * scale).astype(jnp.float32)
    b_k = b[E:2 * E].astype(jnp.float32)
    b_v = b[2 * E:3 * E].astype(jnp.float32)
    return dict(
        w_q=w_q, w_k=w_k, w_v=w_v, b_q=b_q, b_k=b_k, b_v=b_v,
        w_qkv=jnp.concatenate([w_q, w_k, w_v], axis=1),
        b_qkv=jnp.concatenate([b_q, b_k, b_v], axis=0),
        w_out=raw["out_proj_weight"].T.astype(jnp.bfloat16),
        b_out=raw["out_proj_bias"].astype(jnp.float32),
    )


# -------------------------- Pure-JAX reference ------------------------------ #
def _reference(query, key, value, key_padding_mask, raw_params, num_heads):
    tgt, bs, E = query.shape
    src = key.shape[0]
    d_h = E // num_heads
    W, b = raw_params["in_proj_weight"], raw_params["in_proj_bias"]
    q = query @ W[0:E].T + b[0:E]
    k = key @ W[E:2 * E].T + b[E:2 * E]
    v = value @ W[2 * E:].T + b[2 * E:]

    def split(x, L):  # (L, bs, E) -> (bs, h, L, d_h)
        return x.reshape(L, bs, num_heads, d_h).transpose(1, 2, 0, 3)

    qh, kh, vh = split(q, tgt), split(k, src), split(v, src)
    scores = jnp.einsum("bhqd,bhkd->bhqk", qh, kh) / math.sqrt(d_h)
    scores = scores + jnp.where(key_padding_mask, _NEG_INF, 0.0)[:, None, None, :]
    p = jax.nn.softmax(scores, axis=-1)
    ctx = jnp.einsum("bhqk,bhkd->bhqd", p, vh)
    ctx = ctx.transpose(2, 0, 1, 3).reshape(tgt, bs, E)
    out = ctx @ raw_params["out_proj_weight"].T + raw_params["out_proj_bias"]
    return out, p.mean(axis=1)


if __name__ == "__main__":
    embed_dim, num_heads = 128, 4            # E multiple of 128 -> lane-aligned heads/blocks
    tgt_len, src_len, bs = 8, 8, 2

    root = jax.random.PRNGKey(0)
    kq, kk, kv, kp = jax.random.split(root, 4)

    raw_params = init_params(kp, embed_dim)
    params = prepare_params(raw_params, embed_dim, num_heads)
    query = jax.random.normal(kq, (tgt_len, bs, embed_dim), jnp.float32)
    key_t = jax.random.normal(kk, (src_len, bs, embed_dim), jnp.float32)
    value = jax.random.normal(kv, (src_len, bs, embed_dim), jnp.float32)
    # batch 1 has its last two key positions padded; batch 0 unpadded
    key_padding_mask = jnp.zeros((bs, src_len), jnp.bool_).at[1, src_len - 2:].set(True)

    # cross-attention (general, unfused path) with weights
    attn_output, attn_weights = multihead_attention(
        query, key_t, value, key_padding_mask, params, num_heads)
    # self-attention (fused QKV, column-block DMA path), no weights
    self_out = multihead_attention(
        query, query, query, key_padding_mask, params, num_heads,
        need_weights=False)
    jax.block_until_ready((attn_output, attn_weights, self_out))

    assert attn_output.shape == (tgt_len, bs, embed_dim)
    assert attn_weights.shape == (bs, tgt_len, src_len)
    assert self_out.shape == (tgt_len, bs, embed_dim)

    ref_out, ref_w = _reference(query, key_t, value, key_padding_mask,
                                raw_params, num_heads)
    ref_self = _reference(query, query, query, key_padding_mask,
                          raw_params, num_heads)[0]
    # bf16 MXU operands / bf16 activations between kernels set the tolerance
    assert bool(jnp.allclose(attn_output, ref_out, atol=5e-2, rtol=5e-2))
    assert bool(jnp.allclose(attn_weights, ref_w, atol=2e-2, rtol=2e-2))
    assert bool(jnp.allclose(self_out, ref_self, atol=5e-2, rtol=5e-2))
    print("KERNEL_OK")
</pallas_src>

<mosaic_0001>
module attributes {stable_mosaic.version = 11 : i64} {
  func.func @_linear_kernel(%arg0: i32, %arg1: memref<16x128xf32, #tpu.memory_space<vmem>>, %arg2: memref<128x128xbf16, #tpu.memory_space<vmem>>, %arg3: memref<1x128xf32, #tpu.memory_space<vmem>>, %arg4: memref<16x128xbf16, #tpu.memory_space<vmem>>) attributes {dimension_semantics = [#tpu.dimension_semantics<parallel>], iteration_bounds = array<i64: 1>, scalar_prefetch = 0 : i64, scratch_operands = 0 : i64, tpu.core_type = #tpu.core_type<tc>, window_params = [{transform_indices = @transform_0, window_bounds = array<i64: 16, 128>}, {pipeline_mode = #tpu.pipeline_mode<synchronous>, transform_indices = @transform_1, window_bounds = array<i64: 128, 128>}, {pipeline_mode = #tpu.pipeline_mode<synchronous>, transform_indices = @transform_2, window_bounds = array<i64: 1, 128>}, {transform_indices = @transform_3, window_bounds = array<i64: 16, 128>}]} {
    %c0 = arith.constant 0 : index
    %c0_0 = arith.constant 0 : index
    %0 = vector.load %arg1[%c0, %c0_0] : memref<16x128xf32, #tpu.memory_space<vmem>>, vector<16x128xf32>
    %1 = arith.truncf %0 : vector<16x128xf32> to vector<16x128xbf16>
    %c0_1 = arith.constant 0 : index
    %c0_2 = arith.constant 0 : index
    %2 = vector.load %arg2[%c0_1, %c0_2] : memref<128x128xbf16, #tpu.memory_space<vmem>>, vector<128x128xbf16>
    %cst = arith.constant dense<0.000000e+00> : vector<16x128xf32>
    %3 = tpu.matmul %1, %2, %cst {dimension_numbers = #tpu.dot_dimension_numbers<[1], [0], [0], [1], [0, 0, 1, 1], [], []>} : vector<16x128xbf16>, vector<128x128xbf16>, vector<16x128xf32> -> vector<16x128xf32>
    %c0_3 = arith.constant 0 : index
    %c0_4 = arith.constant 0 : index
    %4 = vector.load %arg3[%c0_3, %c0_4] : memref<1x128xf32, #tpu.memory_space<vmem>>, vector<1x128xf32>
    %5 = vector.broadcast %4 : vector<1x128xf32> to vector<16x128xf32>
    %6 = arith.addf %3, %5 : vector<16x128xf32>
    %7 = arith.truncf %6 : vector<16x128xf32> to vector<16x128xbf16>
    %c0_5 = arith.constant 0 : index
    %c0_6 = arith.constant 0 : index
    %8 = vector.load %arg4[%c0_5, %c0_6] : memref<16x128xbf16, #tpu.memory_space<vmem>>, vector<16x128xbf16>
    tpu.vector_store %arg4[%c0_5, %c0_6], %7 {strides = array<i32>} : memref<16x128xbf16, #tpu.memory_space<vmem>>, vector<16x128xbf16>,
    return
  }
  func.func @transform_0(%arg0: i32) -> (i32, i32) {
    %c0_i32 = arith.constant 0 : i32
    %c0_i32_0 = arith.constant 0 : i32
    return %arg0, %c0_i32 : i32, i32
  }
  func.func @transform_1(%arg0: i32) -> (i32, i32) {
    %c0_i32 = arith.constant 0 : i32
    %c0_i32_0 = arith.constant 0 : i32
    %c0_i32_1 = arith.constant 0 : i32
    return %c0_i32, %c0_i32_0 : i32, i32
  }
  func.func @transform_2(%arg0: i32) -> (i32, i32) {
    %c0_i32 = arith.constant 0 : i32
    %c0_i32_0 = arith.constant 0 : i32
    %c0_i32_1 = arith.constant 0 : i32
    return %c0_i32, %c0_i32_0 : i32, i32
  }
  func.func @transform_3(%arg0: i32) -> (i32, i32) {
    %c0_i32 = arith.constant 0 : i32
    %c0_i32_0 = arith.constant 0 : i32
    return %arg0, %c0_i32 : i32, i32
  }
}

</mosaic_0001>

<bundles_post_ra>
// kernel: tpu_custom_call.1
= control target key start
LH: loop header
LB: loop body
LE: loop exit
PB: predicated region body
PF: predicated region fallthrough
CT: control target
= control target key end

     0   :  { %8 = vsyncpa [#allocation3], 0  ;;  %s397_s0 = inlined_call_operand.hbm [shape: f32[16,128], index: 0, kind: input, shape index: {}]   ;;  %s398_s1 = inlined_call_operand.hbm [shape: bf16[128,128], index: 1, kind: input, shape index: {}]   ;;  %s399_s2 = inlined_call_operand.vmem [shape: f32[1,128], index: 2, kind: input, shape index: {}]   ;;  %s400_s3 = inlined_call_operand.hbm [shape: bf16[16,128], index: 3, kind: output, shape index: {}]  }
   0x1   :  { %9 = vsyncpa [#allocation6], 0 }
   0x2   :  { %10 = vsyncpa [#allocation4], 0  ;;  %s323_s12 = smov [#allocation2]   ;;  %s251_s16 = scalar_lea.hbm %s397_s0, 256 }
   0x3   :  { %s16_s13 = sshll.u32 %s323_s12, 4  ;;  %p252_p0 = scmp.ne.s32.totalorder %s397_s0, %s251_s16  ;;  %s17_s13 = int_to_ptr.vmem [resolvable:$true] %s16_s13 }
   0x4   :  { %p255_p1 = scmp.lt.u32.totalorder %s251_s16, %s397_s0 }
   0x6   :  { %p257_p2 = pnand %p255_p1, %p252_p0 }
   0x8   :  { %260 = shalt.err (!%p257_p2)
}
   0x9   :  { %s261_s21 = scalar_lea.vmem %s17_s13, 256  ;;  %p266_p4 = scmp.lt.s32.totalorder %s17_s13, %s17_s13 }
   0xa   :  { %p262_p3 = scmp.ne.s32.totalorder %s17_s13, %s261_s21  ;;  %p267_p5 = scmp.lt.s32.totalorder %s261_s21, %s261_s21 }
   0xc   :  { %p268_p6 = por %p267_p5, %p266_p4 }
   0xe   :  { %p269_p7 = pnand %p268_p6, %p262_p3 }
  0x10   :  { %272 = shalt.err (!%p269_p7)
}
  0x11   :  { %s324_s22 = smov 128   ;;  %s325_s23 = smov 8  }
  0x12   :  { %22 = dma.hbm_to_vmem [thread:$0]  %s397_s0, 256, %s17_s13, [#allocation3], %s324_s22, %s324_s22, %s325_s23  }
  0x13   :  { %s326_s26 = smov [#allocation5]   ;;  %s273_s30 = scalar_lea.hbm %s398_s1, 1024 }
  0x14   :  { %s28_s27 = sshll.u32 %s326_s26, 4  ;;  %p274_p8 = scmp.ne.s32.totalorder %s398_s1, %s273_s30  ;;  %s29_s27 = int_to_ptr.vmem [resolvable:$true] %s28_s27 }
  0x15   :  { %p277_p9 = scmp.lt.u32.totalorder %s273_s30, %s398_s1 }
  0x17   :  { %p279_p10 = pnand %p277_p9, %p274_p8 }
  0x19   :  { %282 = shalt.err (!%p279_p10)
}
  0x1a   :  { %s283_s8 = scalar_lea.vmem %s29_s27, 1024  ;;  %p288_p12 = scmp.lt.s32.totalorder %s29_s27, %s29_s27 }
  0x1b   :  { %p284_p11 = scmp.ne.s32.totalorder %s29_s27, %s283_s8  ;;  %p289_p13 = scmp.lt.s32.totalorder %s283_s8, %s283_s8 }
  0x1d   :  { %p290_p0 = por %p289_p13, %p288_p12 }
  0x1f   :  { %p291_p1 = pnand %p290_p0, %p284_p11 }
  0x21   :  { %294 = shalt.err (!%p291_p1)
}
  0x22   :  { %s327_s0 = smov 64   ;;  %s328_s9 = smov 4  }
  0x23   :  { %34 = dma.hbm_to_vmem [thread:$0]  %s398_s1, 1024, %s29_s27, [#allocation6], %s327_s0, %s327_s0, %s328_s9  }
  0x24   :  { %317 = dma.done.wait [#allocation3], 256  }
  0x25   :  { %318 = vsyncadd [#allocation3], 4294967040 }
  0x26   :  { %319 = dma.done.wait [#allocation6], 1024  }
  0x27   :  { %320 = vsyncadd [#allocation6], 4294966272  ;;  %v329_v0 = vmov 0.0   ;;  %vm330_vm0 = vmmov 0   ;;  %v243_v1 = vld [vmem:[#allocation5] sm:$0xff]   ;;  %v244_v2 = vld [vmem:[#allocation5 + $0x8] sm:$0xff]  }
  0x28   :  { %214 = vmatprep.subr.bf16.mxu0 %v329_v0  ;;  %230 = vmatprep.mubr.msk.bf16.mxu0 %vm330_vm0, %v329_v0  ;;  %v245_v3 = vld [vmem:[#allocation5 + $0x10] sm:$0xff]   ;;  %v246_v4 = vld [vmem:[#allocation5 + $0x18] sm:$0xff]   ;;  %v247_v5 = vld [vmem:[#allocation5 + $0x20] sm:$0xff]   ;;  %s331_s13 = smov [#allocation7]  }
  0x29   :  { %215 = vmatpush3.bf16.msra.mxu0 %v243_v1  ;;  %v248_v6 = vld [vmem:[#allocation5 + $0x28] sm:$0xff]   ;;  %v249_v7 = vld [vmem:[#allocation5 + $0x30] sm:$0xff]   ;;  %v250_v8 = vld [vmem:[#allocation5 + $0x38] sm:$0xff]   ;;  %s174_s14 = sshll.u32 %s331_s13, 4  ;;  %s175_s14 = int_to_ptr.vmem [resolvable:$true] %s174_s14 }
  0x2a   :  { %216 = vmatprep.subr.bf16.mxu0 %v329_v0  ;;  %v44_v9 = vld [vmem:[#allocation2] sm:$0xff]  ;;  %v45_v10 = vld [vmem:[#allocation2 + $0x8] sm:$0xff]  ;;  %s295_s15 = scalar_lea.vmem %s175_s14, 128  ;;  %p300_p3 = scmp.lt.s32.totalorder %s175_s14, %s175_s14 }
  0x2b   :  { %v46_v11 = vpack.c.bf16 %v45_v10, %v44_v9  ;;  %v187_v12 = vld [vmem:[%s399_s2] ss:$0 sm:$0xff]  ;;  %p296_p2 = scmp.ne.s32.totalorder %s175_s14, %s295_s15  ;;  %p301_p4 = scmp.lt.s32.totalorder %s295_s15, %s295_s15 }
  0x2d   :  { %217 = vmatpush3.bf16.msra.mxu0 %v244_v2  ;;  %p302_p5 = por %p301_p4, %p300_p3 }
  0x2e   :  { %218 = vmatprep.subr.bf16.mxu0 %v329_v0 }
  0x2f   :  { %p303_p6 = pnand %p302_p5, %p296_p2 }
  0x31   :  { %219 = vmatpush3.bf16.msra.mxu0 %v245_v3 }
  0x32   :  { %220 = vmatprep.subr.bf16.mxu0 %v329_v0 }
  0x35   :  { %221 = vmatpush3.bf16.msra.mxu0 %v246_v4 }
  0x36   :  { %222 = vmatprep.subr.bf16.mxu0 %v329_v0 }
  0x39   :  { %223 = vmatpush3.bf16.msra.mxu0 %v247_v5 }
  0x3a   :  { %224 = vmatprep.subr.bf16.mxu0 %v329_v0 }
  0x3d   :  { %225 = vmatpush3.bf16.msra.mxu0 %v248_v6 }
  0x3e   :  { %226 = vmatprep.subr.bf16.mxu0 %v329_v0 }
  0x41   :  { %227 = vmatpush3.bf16.msra.mxu0 %v249_v7 }
  0x42   :  { %228 = vmatprep.subr.bf16.mxu0 %v329_v0 }
  0x45   :  { %229 = vmatpush3.bf16.msra.mxu0 %v250_v8 }
  0x48   :  { %231 = vmatmul.mubr.bf16.vlgmr.msra.gmra.mrb[0].mxu0 %v46_v11 }
 0x11b   :  { %v152_v13 = vpop.f32.mrb[0].mxu0 }
 0x11c   :  { %v232_v14 = vpop.f32.mrb[1].mxu0  ;;  %v153_v16 = vadd.f32 %v187_v12, %v152_v13 }
 0x11d   :  { %v155_v15 = vpop.f32.mrb[2].mxu0 }
 0x11e   :  { %v156_v17 = vadd.f32 %v187_v12, %v155_v15  ;;  %v233_v18 = vpop.f32.mrb[3].mxu0 }
 0x120   :  { %v203_v19 = vpack.c.bf16 %v156_v17, %v153_v16 }
 0x122   :  { %204 = vst [vmem:[#allocation7] sm:$0xff] %v203_v19  }
 0x123   :  { %306 = shalt.err (!%p303_p6)
}
 0x124   :  { %s307_s17 = scalar_lea.hbm %s400_s3, 128 }
 0x125   :  { %p308_p7 = scmp.ne.s32.totalorder %s400_s3, %s307_s17  ;;  %p311_p8 = scmp.lt.u32.totalorder %s307_s17, %s400_s3 }
 0x127   :  { %p313_p9 = pnand %p311_p8, %p308_p7 }
 0x129   :  { %316 = shalt.err (!%p313_p9)
}
 0x12a   :  { %180 = dma.vmem_to_hbm [thread:$0]  %s175_s14, 128, %s400_s3, [#allocation4], %s327_s0, %s327_s0, %s328_s9  }
 0x12b   :  { %321 = dma.done.wait [#allocation4], 128  }
 0x12c   :  { %322 = vsyncadd [#allocation4], 4294967168 }
 0x12d   :  { %184 = vsyncpa [#allocation3], 1 }
 0x12e   :  { %185 = vsyncpa [#allocation6], 1 }
 0x12f   :  { %186 = vsyncpa [#allocation4], 1 }

</bundles_post_ra>
